<compile_context>
chip_gen: v7x
topology: tpu7x:2x2x1
jax: 0.10.0
libtpu: 0.0.40
codegen_flags: <defaults>
</compile_context>

<pallas_src>
import jax
import jax.numpy as jnp
from jax import lax
from jax.experimental import pallas as pl
from jax.experimental.pallas import tpu as pltpu


def _make_kernel(chunk, n_chunks, compute_dtype):
    """Kernel factory: one batch tile, feature-major, chunked along lanes.

    Per-tile ref shapes:
      xt_ref: (5, tb)   input tile, batch on the lane axis
      w1_ref: (10, 5)   fc1.weight (PyTorch layout: out x in)
      b1_ref: (10, 1)   fc1.bias as a column
      w2_ref: (10, 1)   fc2.weight as a column
      b2_ref: (1, 1)    fc2.bias
      o_ref : (1, tb)   sigmoid output, lane-dense
    """

    def kernel(xt_ref, w1_ref, b1_ref, w2_ref, b2_ref, o_ref):
        cd = compute_dtype
        # Hoist all parameter reads / casts out of the chunk loop (JAX does not
        # CSE broadcast_in_dim, and these are tiny).
        w1 = w1_ref[...]                                        # (10, 5) f32
        w1c = [w1[:, k:k + 1].astype(cd) for k in range(w1.shape[1])]
        b1 = b1_ref[...].astype(cd)                             # (10, 1)
        w2 = w2_ref[...].astype(cd)                             # (10, 1)
        b2 = b2_ref[...]                                        # (1, 1) f32

        def body(c, carry):
            start = c * chunk
            if not isinstance(start, int):
                start = pl.multiple_of(start, chunk)
            xt = xt_ref[:, pl.ds(start, chunk)].astype(cd)      # (5, C)

            # Layer 1: h^T = relu(W1 @ x^T + b1), K=5 unrolled as VPU
            # broadcast-FMAs (an MXU call would waste >99% of a tile here).
            acc = w1c[0] * xt[0:1, :]                           # (10, C)
            for k in range(1, len(w1c)):
                acc = acc + w1c[k] * xt[k:k + 1, :]
            h = jnp.maximum(acc + b1, 0.0)                      # (10, C)

            # Layer 2: z = W2 @ h^T + b2 as mul + sublane reduce (XLU slot),
            # accumulation in f32 regardless of compute_dtype.
            z = jnp.sum((h * w2).astype(jnp.float32), axis=0, keepdims=True) + b2

            # Sigmoid's exp/recip lower to the EUP (separate VLIW slot).
            o_ref[:, pl.ds(start, chunk)] = jax.nn.sigmoid(z)   # (1, C) lane-dense
            return carry

        if n_chunks == 1:
            body(0, 0)
        else:
            lax.fori_loop(0, n_chunks, body, 0, unroll=(n_chunks <= 8))

    return kernel


def simple_nn_forward_feature_major(xt, w1, b1, w2, b2, *,
                                    block_b=65536,
                                    compute_dtype=jnp.float32):
    """Forward pass on feature-major activations (preferred entry point).

    xt: (5, B) float input, batch on the trailing (lane) axis
    w1: (10, 5) fc1.weight   b1: (10,) fc1.bias
    w2: (1, 10) fc2.weight   b2: (1,)  fc2.bias
    Returns (B, 1) float32.

    compute_dtype=jnp.bfloat16 halves VALU pressure on v6e/v7x (kernel is
    VALU-bound there); keep f32 on v5e (no bf16 VPU) or when tight tolerances
    are required.
    """
    F, B = xt.shape
    H = w1.shape[0]
    assert block_b % 128 == 0, "batch tile must be a multiple of the 128-lane width"

    # --- batch tiling -------------------------------------------------------
    n_groups = pl.cdiv(B, 128)                    # 128-lane batch groups
    tb_units = max(1, min(block_b // 128, n_groups))
    # v7x megacore: ensure the ("parallel",) grid axis has >= 2 tiles whenever
    # the batch spans >= 2 lane groups, so both TensorCores get work.
    if pl.cdiv(n_groups, tb_units) < 2 and n_groups >= 2:
        tb_units = pl.cdiv(n_groups, 2)
    tb = 128 * tb_units
    grid = pl.cdiv(n_groups, tb_units)
    Bp = tb * grid

    # Pad only when needed (no-op / no extra HBM pass for aligned B).
    if Bp != B:
        xt = jnp.pad(xt, ((0, 0), (0, Bp - B)))

    # --- in-kernel lane chunking --------------------------------------------
    # Bound the live range of the (10, C) intermediates so they stay in vregs
    # instead of being materialized as VMEM scratch at large tiles.
    chunk = tb
    for c in (2048, 1024, 512, 256, 128):
        if tb % c == 0:
            chunk = min(tb, c)
            break
    n_chunks = tb // chunk

    b1c = b1.reshape(H, 1)
    w2c = w2.reshape(H, 1)
    b2c = b2.reshape(1, 1)

    out_row = pl.pallas_call(
        _make_kernel(chunk, n_chunks, compute_dtype),
        out_shape=jax.ShapeDtypeStruct((1, Bp), jnp.float32),
        grid_spec=pltpu.PrefetchScalarGridSpec(
            num_scalar_prefetch=0,
            grid=(grid,),
            in_specs=[
                pl.BlockSpec((F, tb), lambda i: (0, i)),   # streamed batch tile
                pl.BlockSpec((H, F), lambda i: (0, 0)),    # VMEM-resident params
                pl.BlockSpec((H, 1), lambda i: (0, 0)),
                pl.BlockSpec((H, 1), lambda i: (0, 0)),
                pl.BlockSpec((1, 1), lambda i: (0, 0)),
            ],
            out_specs=pl.BlockSpec((1, tb), lambda i: (0, i)),
        ),
        compiler_params=pltpu.CompilerParams(
            # Independent batch tiles -> v7x megacore can split them.
            dimension_semantics=("parallel",),
            # Covers v5e's 16 MiB default scoped VMEM at large tiles; actual
            # double-buffered footprint at tb=65536 is only ~10 MiB.
            vmem_limit_bytes=32 * 1024 * 1024,
        ),
        cost_estimate=pl.CostEstimate(
            flops=121 * B,
            transcendentals=2 * B,
            bytes_accessed=24 * B,
        ),
    )(xt, w1, b1c, w2c, b2c)

    # (1, Bp) lane-dense row -> (B, 1) column (metadata-only reshape + slice).
    return out_row.reshape(Bp, 1)[:B]


def simple_nn_forward(x, w1, b1, w2, b2, **kwargs):
    """PyTorch-parity entry point: x is (B, 5) batch-major.

    The transpose below is one extra HBM pass over x; if the producer can emit
    feature-major (5, B) activations, call simple_nn_forward_feature_major
    directly and skip it (the single biggest lever at large B).
    """
    return simple_nn_forward_feature_major(x.T, w1, b1, w2, b2, **kwargs)


def init_params(key):
    # Deterministic init mimicking nn.Linear's uniform(-1/sqrt(fan_in), +...),
    # stored in PyTorch layouts: weight (out, in), bias (out,).
    k1, k2, k3, k4 = jax.random.split(key, 4)
    lim1 = 1.0 / jnp.sqrt(5.0)
    lim2 = 1.0 / jnp.sqrt(10.0)
    w1 = jax.random.uniform(k1, (10, 5), jnp.float32, -lim1, lim1)   # fc1.weight
    b1 = jax.random.uniform(k2, (10,), jnp.float32, -lim1, lim1)     # fc1.bias
    w2 = jax.random.uniform(k3, (1, 10), jnp.float32, -lim2, lim2)   # fc2.weight
    b2 = jax.random.uniform(k4, (1,), jnp.float32, -lim2, lim2)      # fc2.bias
    return w1, b1, w2, b2


if __name__ == "__main__":
    key = jax.random.PRNGKey(0)
    kx, kp = jax.random.split(key)

    # Small demo batch: 256 rows -> two 128-lane batch tiles, so the grid has
    # 2 steps (exercises the pipeline and the "parallel" axis), no padding.
    B = 256
    x = jax.random.normal(kx, (B, 5), jnp.float32)
    w1, b1, w2, b2 = init_params(kp)

    out = simple_nn_forward(x, w1, b1, w2, b2)          # f32 compute (default)
    out = jax.block_until_ready(out)

    # Plain-JAX reference (also what you should use in production for tiny B).
    ref = jax.nn.sigmoid(jnp.maximum(x @ w1.T + b1, 0.0) @ w2.T + b2)

    assert out.shape == (B, 1)
    assert jnp.allclose(out, ref, atol=1e-5, rtol=1e-5)
    print("KERNEL_OK")
</pallas_src>

<mosaic_0001>
module attributes {stable_mosaic.version = 11 : i64} {
  func.func @kernel(%arg0: i32, %arg1: memref<5x128xf32, #tpu.memory_space<vmem>>, %arg2: memref<10x5xf32, #tpu.memory_space<vmem>>, %arg3: memref<10x1xf32, #tpu.memory_space<vmem>>, %arg4: memref<10x1xf32, #tpu.memory_space<vmem>>, %arg5: memref<1x1xf32, #tpu.memory_space<vmem>>, %arg6: memref<1x128xf32, #tpu.memory_space<vmem>>) attributes {dimension_semantics = [#tpu.dimension_semantics<parallel>], iteration_bounds = array<i64: 2>, scalar_prefetch = 0 : i64, scratch_operands = 0 : i64, tpu.core_type = #tpu.core_type<tc>, window_params = [{transform_indices = @transform_0, window_bounds = array<i64: 5, 128>}, {pipeline_mode = #tpu.pipeline_mode<synchronous>, transform_indices = @transform_1, window_bounds = array<i64: 10, 5>}, {pipeline_mode = #tpu.pipeline_mode<synchronous>, transform_indices = @transform_2, window_bounds = array<i64: 10, 1>}, {pipeline_mode = #tpu.pipeline_mode<synchronous>, transform_indices = @transform_3, window_bounds = array<i64: 10, 1>}, {pipeline_mode = #tpu.pipeline_mode<synchronous>, transform_indices = @transform_4, window_bounds = array<i64: 1, 1>}, {transform_indices = @transform_5, window_bounds = array<i64: 1, 128>}]} {
    %c0 = arith.constant 0 : index
    %c0_0 = arith.constant 0 : index
    %0 = vector.load %arg2[%c0, %c0_0] : memref<10x5xf32, #tpu.memory_space<vmem>>, vector<10x5xf32>
    %1 = vector.extract_strided_slice %0 {offsets = [0, 0], sizes = [10, 1], strides = [1, 1]} : vector<10x5xf32> to vector<10x1xf32>
    %2 = vector.extract_strided_slice %0 {offsets = [0, 1], sizes = [10, 1], strides = [1, 1]} : vector<10x5xf32> to vector<10x1xf32>
    %3 = vector.extract_strided_slice %0 {offsets = [0, 2], sizes = [10, 1], strides = [1, 1]} : vector<10x5xf32> to vector<10x1xf32>
    %4 = vector.extract_strided_slice %0 {offsets = [0, 3], sizes = [10, 1], strides = [1, 1]} : vector<10x5xf32> to vector<10x1xf32>
    %5 = vector.extract_strided_slice %0 {offsets = [0, 4], sizes = [10, 1], strides = [1, 1]} : vector<10x5xf32> to vector<10x1xf32>
    %c0_1 = arith.constant 0 : index
    %c0_2 = arith.constant 0 : index
    %6 = vector.load %arg3[%c0_1, %c0_2] : memref<10x1xf32, #tpu.memory_space<vmem>>, vector<10x1xf32>
    %c0_3 = arith.constant 0 : index
    %c0_4 = arith.constant 0 : index
    %7 = vector.load %arg4[%c0_3, %c0_4] : memref<10x1xf32, #tpu.memory_space<vmem>>, vector<10x1xf32>
    %c0_5 = arith.constant 0 : index
    %c0_6 = arith.constant 0 : index
    %8 = vector.load %arg5[%c0_5, %c0_6] : memref<1x1xf32, #tpu.memory_space<vmem>>, vector<1x1xf32>
    %c0_7 = arith.constant 0 : index
    %c0_8 = arith.constant 0 : index
    %9 = vector.load %arg1[%c0_7, %c0_8] : memref<5x128xf32, #tpu.memory_space<vmem>>, vector<5x128xf32>
    %10 = vector.extract_strided_slice %9 {offsets = [0, 0], sizes = [1, 128], strides = [1, 1]} : vector<5x128xf32> to vector<1x128xf32>
    %11 = vector.broadcast %1 : vector<10x1xf32> to vector<10x128xf32>
    %12 = vector.broadcast %10 : vector<1x128xf32> to vector<10x128xf32>
    %13 = arith.mulf %11, %12 : vector<10x128xf32>
    %14 = vector.extract_strided_slice %9 {offsets = [1, 0], sizes = [1, 128], strides = [1, 1]} : vector<5x128xf32> to vector<1x128xf32>
    %15 = vector.broadcast %2 : vector<10x1xf32> to vector<10x128xf32>
    %16 = vector.broadcast %14 : vector<1x128xf32> to vector<10x128xf32>
    %17 = arith.mulf %15, %16 : vector<10x128xf32>
    %18 = arith.addf %13, %17 : vector<10x128xf32>
    %19 = vector.extract_strided_slice %9 {offsets = [2, 0], sizes = [1, 128], strides = [1, 1]} : vector<5x128xf32> to vector<1x128xf32>
    %20 = vector.broadcast %3 : vector<10x1xf32> to vector<10x128xf32>
    %21 = vector.broadcast %19 : vector<1x128xf32> to vector<10x128xf32>
    %22 = arith.mulf %20, %21 : vector<10x128xf32>
    %23 = arith.addf %18, %22 : vector<10x128xf32>
    %24 = vector.extract_strided_slice %9 {offsets = [3, 0], sizes = [1, 128], strides = [1, 1]} : vector<5x128xf32> to vector<1x128xf32>
    %25 = vector.broadcast %4 : vector<10x1xf32> to vector<10x128xf32>
    %26 = vector.broadcast %24 : vector<1x128xf32> to vector<10x128xf32>
    %27 = arith.mulf %25, %26 : vector<10x128xf32>
    %28 = arith.addf %23, %27 : vector<10x128xf32>
    %29 = vector.extract_strided_slice %9 {offsets = [4, 0], sizes = [1, 128], strides = [1, 1]} : vector<5x128xf32> to vector<1x128xf32>
    %30 = vector.broadcast %5 : vector<10x1xf32> to vector<10x128xf32>
    %31 = vector.broadcast %29 : vector<1x128xf32> to vector<10x128xf32>
    %32 = arith.mulf %30, %31 : vector<10x128xf32>
    %33 = arith.addf %28, %32 : vector<10x128xf32>
    %34 = vector.broadcast %6 : vector<10x1xf32> to vector<10x128xf32>
    %35 = arith.addf %33, %34 : vector<10x128xf32>
    %cst = arith.constant 0.000000e+00 : f32
    %36 = vector.broadcast %cst : f32 to vector<10x128xf32>
    %37 = arith.maximumf %35, %36 : vector<10x128xf32>
    %38 = vector.broadcast %7 : vector<10x1xf32> to vector<10x128xf32>
    %39 = arith.mulf %37, %38 : vector<10x128xf32>
    %cst_9 = arith.constant dense<0.000000e+00> : vector<128xf32>
    %40 = vector.multi_reduction <add>, %39, %cst_9 [0] : vector<10x128xf32> to vector<128xf32>
    %41 = vector.shape_cast %40 : vector<128xf32> to vector<1x128xf32>
    %42 = vector.broadcast %8 : vector<1x1xf32> to vector<1x128xf32>
    %43 = arith.addf %41, %42 : vector<1x128xf32>
    %44 = arith.negf %43 : vector<1x128xf32>
    %45 = math.exp %44 : vector<1x128xf32>
    %cst_10 = arith.constant 1.000000e+00 : f32
    %46 = vector.broadcast %cst_10 : f32 to vector<1x128xf32>
    %47 = arith.addf %46, %45 : vector<1x128xf32>
    %48 = arith.divf %46, %47 : vector<1x128xf32>
    %c0_11 = arith.constant 0 : index
    %c0_12 = arith.constant 0 : index
    %49 = vector.load %arg6[%c0_11, %c0_12] : memref<1x128xf32, #tpu.memory_space<vmem>>, vector<1x128xf32>
    tpu.vector_store %arg6[%c0_11, %c0_12], %48 {strides = array<i32>} : memref<1x128xf32, #tpu.memory_space<vmem>>, vector<1x128xf32>,
    return
  }
  func.func @transform_0(%arg0: i32) -> (i32, i32) {
    %c0_i32 = arith.constant 0 : i32
    %c0_i32_0 = arith.constant 0 : i32
    return %c0_i32, %arg0 : i32, i32
  }
  func.func @transform_1(%arg0: i32) -> (i32, i32) {
    %c0_i32 = arith.constant 0 : i32
    %c0_i32_0 = arith.constant 0 : i32
    %c0_i32_1 = arith.constant 0 : i32
    return %c0_i32, %c0_i32_0 : i32, i32
  }
  func.func @transform_2(%arg0: i32) -> (i32, i32) {
    %c0_i32 = arith.constant 0 : i32
    %c0_i32_0 = arith.constant 0 : i32
    %c0_i32_1 = arith.constant 0 : i32
    return %c0_i32, %c0_i32_0 : i32, i32
  }
  func.func @transform_3(%arg0: i32) -> (i32, i32) {
    %c0_i32 = arith.constant 0 : i32
    %c0_i32_0 = arith.constant 0 : i32
    %c0_i32_1 = arith.constant 0 : i32
    return %c0_i32, %c0_i32_0 : i32, i32
  }
  func.func @transform_4(%arg0: i32) -> (i32, i32) {
    %c0_i32 = arith.constant 0 : i32
    %c0_i32_0 = arith.constant 0 : i32
    %c0_i32_1 = arith.constant 0 : i32
    return %c0_i32, %c0_i32_0 : i32, i32
  }
  func.func @transform_5(%arg0: i32) -> (i32, i32) {
    %c0_i32 = arith.constant 0 : i32
    %c0_i32_0 = arith.constant 0 : i32
    return %c0_i32, %arg0 : i32, i32
  }
}

</mosaic_0001>

<bundles_post_ra>
// kernel: tpu_custom_call.1
= control target key start
LH: loop header
LB: loop body
LE: loop exit
PB: predicated region body
PF: predicated region fallthrough
CT: control target
= control target key end

     0   :  { %s718_s0 = inlined_call_operand.vmem [shape: f32[5,256], index: 0, kind: input, shape index: {}]   ;;  %s719_s1 = inlined_call_operand.vmem [shape: f32[10,5], index: 1, kind: input, shape index: {}]   ;;  %s720_s2 = inlined_call_operand.vmem [shape: f32[10,1], index: 2, kind: input, shape index: {}]   ;;  %s721_s3 = inlined_call_operand.vmem [shape: f32[10,1], index: 3, kind: input, shape index: {}]   ;;  %s722_s4 = inlined_call_operand.<no memory space> [shape: f32[1,1], index: 4, kind: input, shape index: {}]   ;;  %s723_s5 = inlined_call_operand.hbm [shape: f32[1,256], index: 5, kind: output, shape index: {}]  }
   0x1   :  { %v10_v0 = vstv %s722_s4 }
   0x2   :  { %11 = vst [vmem:[#allocation2] sm:$0x1] %v10_v0 }
   0x3   :  { %12 = vsyncpa [#allocation4], 0 }
   0x4   :  { %14 = vsyncpa [#allocation4 + $0x1], 0  ;;  %s600_s20 = smov 0   ;;  %s602_s21 = smov 0  }
   0x5   :  { %s604_s22 = smov 0   ;;  %s606_s23 = smov 0  }
   0x6 LB: > { %s621_s4 = sadd.s32 4294967295, %s559_s23   ;;  %s429_s24 = sadd.s32 4294967294, %s559_s23   ;;  %s559_s23 = sphi %s606_s23, %s729_s23   ;;  %s555_s22 = sphi %s604_s22, %s728_s22   ;;  %s551_s21 = sphi %s602_s21, %s727_s21   ;;  %s547_s20 = sphi %s600_s20, %s726_s20  }
   0x7   : > { %s625_s25 = sadd.s32 1, %s559_s23   ;;  %s137_s26 = sadd.s32 1, %s555_s22 }
   0x8   : > { %s134_s27 = ssub.s32 %s559_s23, %s625_s25  ;;  %p147_p0 = scmp.ne.s32.totalorder %s555_s22, %s551_s21 }
   0x9   : > { %p135_p1 = scmp.eq.s32.totalorder %s134_s27, 0  ;;  %p148_p2 = scmp.eq.s32.totalorder %s621_s4, 1 }
   0xa   : > { %p153_p3 = scmp.ne.s32.totalorder %s551_s21, %s547_s20  ;;  %p154_p4 = scmp.eq.s32.totalorder %s429_s24, 1 }
   0xb   : > { %s636_s28 = scalar_select %p135_p1, %s555_s22, %s137_s26  }
   0xc   : > { %p638_p5 = por %p148_p2, %p147_p0  ;;  %p642_p6 = por %p154_p4, %p153_p3 }
   0xd   : > { %p432_p7 = scmp.ge.s32.totalorder %s559_s23, 1  ;;  %p191_p8 = scmp.lt.s32.totalorder %s559_s23, 3 }
   0xf   : > { %p192_p9 = pnand %p432_p7, %p191_p8 }
  0x10   : > { %v222_v1 = vld [vmem:[%s719_s1 + $0x8] sm:$0x3] (!%p192_p9)  ;;  %v221_v2 = vld [vmem:[%s719_s1] sm:$0xff] (!%p192_p9)  ;;  %v561_v3 = vmov (!%p192_p9), 0   ;;  %v562_v4 = vmov (!%p192_p9), 1   ;;  %v563_v5 = vmov (!%p192_p9), 2   ;;  %v239_v13 = vlaneseq (!%p192_p9) }
  0x11   : > { %195 = sbr.rel (%p192_p9) target bundleno = 241 (0xf1), region = 40  ;;  %484 = vset.pattern.permute.xlu1 (!%p192_p9), %v561_v3  ;;  %482 = vset.pattern.permute.xlu0 (!%p192_p9), %v561_v3  ;;  %v564_v6 = vmov (!%p192_p9), 3   ;;  %v565_v7 = vmov (!%p192_p9), 4   ;;  %v223_v8 = vld [vmem:[%s720_s2] sm:$0xff] (!%p192_p9)  ;;  %v224_v10 = vld [vmem:[%s720_s2 + $0x8] sm:$0x3] (!%p192_p9) }
  0x12   : > { %236 = vperm.xlu0 (!%p192_p9), %482, %v222_v1   ;;  %231 = vperm.xlu1 (!%p192_p9), %484, %v221_v2   ;;  %v227_v9 = vld [vmem:[#allocation2] sm:$0x1] (!%p192_p9)  ;;  %v226_v11 = vld [vmem:[%s721_s3 + $0x8] sm:$0x3] (!%p192_p9)  ;;  %p217_p10 = scmp.lt.s32.totalorder (!%p192_p9), %s621_s4, 1  ;;  %v240_v15 = vshrl.u32 (!%p192_p9), %v239_v13, 7 }
  0x13   : > { %v225_v12 = vld [vmem:[%s721_s3] sm:$0xff] (!%p192_p9)  ;;  %vm335_vm0 = vcmask (!%p192_p9), 1041408   ;;  %s215_s6 = sand.u32 (!%p192_p9), 1, %s551_s21   ;;  %s435_s7 = sshll.u32 (!%p192_p9), %s621_s4, 4 }
  0x14   : > { %v241_v18 = vsub.s32 (!%p192_p9), 0, %v240_v15  ;;  %v255_v19 = vsub.s32 (!%p192_p9), 1, %v240_v15  ;;  %v271_v21 = vsub.s32 (!%p192_p9), 2, %v240_v15  ;;  %v287_v26 = vsub.s32 (!%p192_p9), 3, %v240_v15  ;;  %s216_s8 = scalar_lea.vmem (!%p192_p9), [#allocation3], %s215_s6  ;;  %s676_s12 = scalar_lea.hbm (!%p192_p9), %s723_s5, %s435_s7 }
  0x15   : > { %v303_v32 = vsub.s32 (!%p192_p9), 4, %v240_v15  ;;  %s374_s9 = sshll.u32 (!%p192_p9), %s216_s8, 4  ;;  %s362_s13 = scalar_lea.sflag (!%p192_p9), [#allocation4], %s215_s6  ;;  %s678_s9 = int_to_ptr.vmem [resolvable:$true] %s374_s9 }
  0x16   : > { %483 = vset.pattern.permute.xlu0 (!%p192_p9), %v562_v4  ;;  %485 = vset.pattern.permute.xlu1 (!%p192_p9), %v562_v4  ;;  %s497_s14 = scalar_lea.vmem (!%p192_p9), %s678_s9, 16 }
  0x17   : > { %250 = vperm.xlu0 (!%p192_p9), %483, %v222_v1   ;;  %246 = vperm.xlu1 (!%p192_p9), %485, %v221_v2   ;;  %p498_p11 = scmp.ne.s32.totalorder (!%p192_p9), %s678_s9, %s497_s14 }
  0x18   : > { %s218_s18 = scalar_select %p217_p10, %s621_s4, 1 }
  0x19   : > { %p499_p12 = pnand %p498_p11, %p638_p5  ;;  %s566_s4 = smov [#allocation3]  }
  0x1a   : > { %s433_s19 = sshll.u32 %s218_s18, 3  ;;  %s501_s15 = sshll.u32 %s566_s4, 4  ;;  %s502_s15 = int_to_ptr.vmem [resolvable:$false] %s501_s15 }
  0x1b   : > { %487 = vset.pattern.permute.xlu0 %v563_v5  ;;  %486 = vset.pattern.permute.xlu1 %v563_v5  ;;  %s220_s27 = scalar_lea.vmem %s718_s0, %s433_s19  ;;  %p500_p13 = pneg %p499_p12 }
  0x1c   : > { %262 = vperm.xlu0 %487, %v221_v2   ;;  %266 = vperm.xlu1 %486, %v222_v1   ;;  %v228_v20 = vld [vmem:[%s220_s27] sm:$0x1f]  ;;  %s503_s16 = scalar_lea.vmem %s502_s15, 32  ;;  %p504_p0 = scmp.lt.s32.totalorder %s678_s9, %s502_s15 }
  0x1d   : > { %v242_v24 = vrot.slane %v228_v20, %v241_v18  ;;  %v256_v25 = vrot.slane %v228_v20, %v255_v19  ;;  %v272_v29 = vrot.slane %v228_v20, %v271_v21  ;;  %v288_v31 = vrot.slane %v228_v20, %v287_v26  ;;  %p505_p1 = scmp.lt.s32.totalorder %s503_s16, %s497_s14 }
  0x1e   : > { %v304_v41 = vrot.slane %v228_v20, %v303_v32 }
  0x1f   : > { %p506_p2 = por %p505_p1, %p504_p0 }
  0x20   : > { %488 = vset.pattern.permute.xlu1 %v564_v6  ;;  %489 = vset.pattern.permute.xlu0 %v565_v7 }
  0x21   : > { %282 = vperm.xlu1 %488, %v222_v1   ;;  %298 = vperm.xlu0 %489, %v222_v1   ;;  %p507_p3 = pnand %p506_p2, %p500_p13 }
  0x25   : > { %278 = vperm.xlu1 %488, %v221_v2   ;;  %492 = vset.pattern.permute.xlu0 %v561_v3 }
  0x26   : > { %311 = vperm.xlu0 %492, %v223_v8  }
  0x29   : > { %490 = vset.pattern.permute.xlu1 %v565_v7 }
  0x2a   : > { %294 = vperm.xlu1 %490, %v221_v2   ;;  %346 = vperm.xlu0 %492, %v227_v9  }
  0x2e   : > { %491 = vset.pattern.permute.xlu1 %v561_v3 }
  0x2f   : > { %316 = vperm.xlu1 %491, %v224_v10  }
  0x33   : > { %330 = vperm.xlu1 %491, %v226_v11  }
  0x37   : > { %325 = vperm.xlu1 %491, %v225_v12  }
  0x91   : > { %v232_v14 = vpop.permute.xlu1 %231  ;;  %v237_v16 = vpop.permute.xlu0 %236 }
  0x92   : > { %v244_v27 = vmul.f32 %v242_v24, %v237_v16  ;;  %v243_v38 = vmul.f32 %v242_v24, %v232_v14 }
  0x96   : > { %v247_v17 = vpop.permute.xlu1 %246  ;;  %v251_v23 = vpop.permute.xlu0 %250 }
  0x97   : > { %v258_v28 = vmul.f32 %v256_v25, %v251_v23  ;;  %v257_v34 = vmul.f32 %v256_v25, %v247_v17 }
  0x99   : > { %v260_v35 = vadd.f32 %v258_v28, %v244_v27  ;;  %v259_v43 = vadd.f32 %v257_v34, %v243_v38 }
  0x9b   : > { %v267_v22 = vpop.permute.xlu1 %266  ;;  %v263_v33 = vpop.permute.xlu0 %262 }
  0x9c   : > { %v274_v36 = vmul.f32 %v272_v29, %v267_v22  ;;  %v273_v39 = vmul.f32 %v272_v29, %v263_v33 }
  0x9e   : > { %v276_v44 = vadd.f32 %v274_v36, %v260_v35  ;;  %v275_v46 = vadd.f32 %v273_v39, %v259_v43 }
  0xa0   : > { %v283_v30 = vpop.permute.xlu1 %282  ;;  %v299_v42 = vpop.permute.xlu0 %298 }
  0xa1   : > { %v290_v40 = vmul.f32 %v288_v31, %v283_v30  ;;  %v306_v48 = vmul.f32 %v304_v41, %v299_v42 }
  0xa3   : > { %v292_v47 = vadd.f32 %v290_v40, %v276_v44 }
  0xa4   : > { %v279_v37 = vpop.permute.xlu1 %278 }
  0xa5   : > { %v289_v45 = vmul.f32 %v288_v31, %v279_v37  ;;  %v308_v53 = vadd.f32 %v306_v48, %v292_v47  ;;  %v312_v54 = vpop.permute.xlu0 %311 }
  0xa7   : > { %v291_v51 = vadd.f32 %v289_v45, %v275_v46 }
  0xa9   : > { %v295_v49 = vpop.permute.xlu1 %294  ;;  %v347_v6 = vpop.permute.xlu0 %346 }
  0xaa   : > { %v305_v50 = vmul.f32 %v304_v41, %v295_v49  ;;  %v352_v8 = vrot.slane %v347_v6, %v241_v18 }
  0xac   : > { %v307_v52 = vadd.f32 %v305_v50, %v291_v51 }
  0xae   : > { %v317_v55 = vpop.permute.xlu1 %316  ;;  %v319_v57 = vadd.f32 %v312_v54, %v307_v52 }
  0xaf   : > { %v320_v56 = vadd.f32 %v317_v55, %v308_v53 }
  0xb0   : > { %v321_v61 = vmax.f32 %v319_v57, 0.0 }
  0xb1   : > { %v322_v58 = vmax.f32 %v320_v56, 0.0 }
  0xb2   : > { %v331_v59 = vpop.permute.xlu1 %330 }
  0xb3   : > { %v334_v60 = vmul.f32 %v331_v59, %v322_v58 }
  0xb5   : > { %v336_v0 = vsel %vm335_vm0, %v334_v60, 0.0 }
  0xb6   : > { %v326_v62 = vpop.permute.xlu1 %325 }
  0xb7   : > { %v333_v63 = vmul.f32 %v326_v62, %v321_v61 }
  0xb9   : > { %v337_v1 = vadd.f32 %v336_v0, %v333_v63 }
  0xbb   : > { %v338_v2 = vrot.slane %v337_v1, 4 }
  0xbd   : > { %v339_v3 = vadd.f32 %v338_v2, %v337_v1 }
  0xbf   : > { %v340_v4 = vrot.slane %v339_v3, 2 }
  0xc1   : > { %v341_v5 = vadd.f32 %v340_v4, %v339_v3 }
  0xc3   : > { %v342_v7 = vrot.slane %v341_v5, 1 }
  0xc5   : > { %v343_v9 = vadd.f32 %v342_v7, %v341_v5 }
  0xc7   : > { %v353_v10 = vadd.f32 %v352_v8, %v343_v9 }
  0xc9   : > { %v434_v11 = vmul.f32 -1.442695, %v353_v10 }
  0xcb   : > { %493 = vpow2.f32 %v434_v11 }
  0xd5   : > { %v494_v12 = vpop.eup %493 }
  0xd6   : > { %v357_v13 = vadd.f32 1.0, %v494_v12 }
  0xd8   : > { %495 = vrcp.f32 %v357_v13 }
  0xe2   : > { %v496_v14 = vpop.eup %495 }
  0xe3   : > { %360 = vst [vmem:[%s216_s8] sm:$0x1] %v496_v14 }
  0xe4   : > { %510 = shalt.err (!%p507_p3)
}
  0xe5   : > { %s511_s17 = scalar_lea.hbm %s676_s12, 16  ;;  %s515_s24 = scalar_lea.hbm %s723_s5, 32 }
  0xe6   : > { %p512_p4 = scmp.ne.s32.totalorder %s676_s12, %s511_s17  ;;  %p516_p9 = scmp.lt.u32.totalorder %s676_s12, %s723_s5 }
  0xe7   : > { %p517_p10 = scmp.lt.u32.totalorder %s515_s24, %s511_s17  ;;  %p519_p12 = scmp.lt.u32.totalorder %s511_s17, %s676_s12 }
  0xe8   : > { %p513_p7 = pnand %p512_p4, %p638_p5 }
  0xe9   : > { %p518_p11 = por %p517_p10, %p516_p9 }
  0xea   : > { %p514_p8 = pneg %p513_p7 }
  0xeb   : > { %p520_p13 = por %p519_p12, %p518_p11 }
  0xed   : > { %p521_p0 = pnand %p520_p13, %p514_p8 }
  0xef   : > { %524 = shalt.err (!%p521_p0)
}
  0xf0   : > { %438 = dma.vmem_to_hbm [thread:$0]  (%p638_p5), %s678_s9, 16, %s676_s12, %s362_s13  }
  0xf1 PF: > { %p444_p1 = scmp.ge.s32.totalorder %s559_s23, 2  ;;  %s386_s6 = sand.u32 1, %s547_s20  }
  0xf2   : > { %s387_s7 = scalar_lea.sflag [#allocation4], %s386_s6 }
  0xf3   : > { %p441_p2 = pnand %p444_p1, %p642_p6 }
  0xf5   : > { %542 = dma.done.wait (!%p441_p2), %s387_s7, 16  }
  0xf6   : > { %544 = vsyncadd (!%p441_p2), %s387_s7, 4294967280  ;;  %p17_p3 = scmp.ge.s32.totalorder %s625_s25, 4   ;;  %s726_s20 = smov %s551_s21 }
  0xf7   : > { %s727_s21 = smov %s555_s22  ;;  %s728_s22 = smov %s636_s28 }
  0xf8   : > { %s729_s23 = smov %s625_s25  ;;  %19 = sbr.rel (!%p17_p3) target bundleno = 6 (0x6), region = 75 }
  0xff   :  { %391 = vsyncpa [#allocation4], 1 }
 0x100   :  { %393 = vsyncpa [#allocation4 + $0x1], 1 }

</bundles_post_ra>
